<compile_context>
chip_gen: v7x
topology: tpu7x:2x2x1
jax: 0.10.0
libtpu: 0.0.40
codegen_flags: <defaults>
</compile_context>

<pallas_src>
import numpy as np
import jax
import jax.numpy as jnp
from jax.experimental import pallas as pl
from jax.experimental.pallas import tpu as pltpu

SA = 4  # spatial_attention


def _selector_kernel(x_ref, binw_ref, w1_ref, w2a_ref, b2a_ref, w2b_ref, b2b_ref,
                     o1_ref, o2_ref):
    tb, C, H, W = x_ref.shape
    ph = H // SA
    in_ch = C * SA * SA

    xv = x_ref[...].astype(jnp.float32)                                   # (tb, C, H, W)

    # ---- adaptive avg-pool, stage 1: W-binning on the MXU ----
    # The only op that touches the full tile. binw carries the whole 1/(ph*pw)
    # average, so no further scaling is needed. The leading-dim collapse/split
    # reshapes leave the minor (sublane/lane) dims untouched (layout-free when
    # H % 8 == 0, which covers the common image sizes).
    xw = xv.reshape(tb * C * H, W)
    rw = jnp.dot(xw, binw_ref[...], preferred_element_type=jnp.float32)   # (tb*C*H, SA)
    r4 = rw.reshape(tb, C, H, SA)

    # ---- stage 2: H-binning + feature gather on the W/4-smaller residue ----
    cols = []
    for i in range(SA):
        s_i = jnp.sum(r4[:, :, i * ph:(i + 1) * ph, :], axis=2)           # (tb, C, SA)
        for j in range(SA):
            cols.append(jnp.sum(s_i[:, :, j:j + 1], axis=-1))             # (tb, C)
    # spatial-major pooled layout ((i*SA + j)*C + c); fc weight is permuted to match.
    pooled = jnp.concatenate(cols, axis=-1)                               # (tb, 16*C)

    # ---- fc: Linear(in_ch -> hidden, bias=False) + ReLU ----
    y = jnp.maximum(
        jnp.dot(pooled, w1_ref[...], preferred_element_type=jnp.float32), 0.0)

    # ---- att_conv1 / att_conv2 (original c-major feature order) ----
    a1 = jnp.dot(y, w2a_ref[...], preferred_element_type=jnp.float32) + b2a_ref[...]
    a2 = jnp.dot(y, w2b_ref[...], preferred_element_type=jnp.float32) + b2b_ref[...]

    # pair softmax over stacked (a1, a2): att1 = sigmoid(a1 - a2), att2 = 1 - att1.
    # One exp + one exact reciprocal; att1 + att2 == 1 exactly.
    s1 = pl.reciprocal(1.0 + jnp.exp(a2 - a1))                            # (tb, in_ch)
    o1_ref[...] = s1.reshape(tb, 1, in_ch)
    o2_ref[...] = (1.0 - s1).reshape(tb, 1, in_ch)


def _vmem_capacity_bytes():
    """Physical VMEM per TensorCore; conservative (v7x, 64 MiB) fallback."""
    try:
        cap = int(pltpu.get_tpu_info().vmem_capacity_bytes)
        if cap > 0:
            return cap
    except Exception:
        pass
    return 64 << 20


def _pick_batch_tile(B, per_sample_bytes, cap_bytes):
    """Largest batch tile with x-tile <= cap; >= 2 grid steps whenever B >= 2.

    tb only ever appears as a leading block dim, so it has no 8-alignment
    constraint and may go down to 1 for very large per-sample footprints.
    """
    tb = max(1, int(cap_bytes // max(per_sample_bytes, 1)))
    tb = min(tb, B)
    if B >= 2:
        tb = min(tb, (B + 1) // 2)      # keep both v7x TensorCores busy
    return tb


def prepare_params(params):
    """One-time weight prep (hoisted out of the per-call forward)."""
    w_fc = params["w_fc"]                                # (hidden, in_ch), cols = c*16 + i*4 + j
    hidden, in_ch = w_fc.shape
    C = in_ch // (SA * SA)
    # Permute fc weight rows to the kernel's spatial-major (i, j, c) pooled order.
    w1p = jnp.transpose(
        w_fc.reshape(hidden, C, SA, SA), (2, 3, 1, 0)).reshape(in_ch, hidden)
    return {
        "w1p": w1p.astype(jnp.float32),                        # (in_ch, hidden)
        "w2a": params["w_att1"].T.astype(jnp.float32),         # (hidden, in_ch)
        "b2a": params["b_att1"].reshape(1, in_ch).astype(jnp.float32),
        "w2b": params["w_att2"].T.astype(jnp.float32),         # (hidden, in_ch)
        "b2b": params["b_att2"].reshape(1, in_ch).astype(jnp.float32),
    }


def selector_forward_small(x, prepped):
    """Attention maps before upsampling: two (B, C, 4, 4) arrays."""
    B, C, H, W = x.shape
    assert H % SA == 0 and W % SA == 0, "kernel supports H, W divisible by 4"
    # TODO(synk): general AdaptiveAvgPool2d bin boundaries / fractional nearest
    # interpolation for H, W not divisible by 4 are not implemented.
    in_ch = C * SA * SA
    hidden = prepped["w1p"].shape[1]
    ph, pw = H // SA, W // SA

    # Compile-time W-bin averaging matrix; carries the whole 1/(ph*pw) scale.
    binw_np = np.zeros((W, SA), np.float32)
    for j in range(SA):
        binw_np[j * pw:(j + 1) * pw, j] = 1.0 / float(ph * pw)
    binw = jnp.asarray(binw_np)

    itemsize = jnp.dtype(x.dtype).itemsize   # note: feeding bf16 x halves HBM traffic
    per_b = C * H * W * itemsize
    vmem_cap = _vmem_capacity_bytes()                       # 64 MiB v7x, 128 MiB v5e/v6e
    tile_cap = min(16 << 20, max(2 << 20, vmem_cap // 8))   # ~8 MiB v7x, ~16 MiB v5e/v6e
    tb = _pick_batch_tile(B, per_b, tile_cap)
    nb = pl.cdiv(B, tb)
    # TODO(synk): if a single sample exceeds the tile cap (C*H*W bytes > ~8-16 MiB),
    # add an inner "arbitrary" grid axis over H with a VMEM accumulator for the
    # 16 bin sums instead of loading the whole sample at once.

    # VMEM budget: double-buffered x tile + f32 working copy + double-buffered
    # (tiny) outputs + resident weights + headroom; clamped below physical VMEM.
    x_tile = tb * per_b
    work = tb * C * H * W * 4
    out_tiles = 2 * tb * in_ch * 4
    resident = 4 * (in_ch * hidden + 2 * hidden * in_ch + 2 * in_ch + W * SA)
    vmem_limit = 2 * x_tile + work + 2 * out_tiles + resident + (8 << 20)
    vmem_limit = max(vmem_limit, 16 << 20)
    vmem_limit = min(vmem_limit, vmem_cap - (4 << 20))

    o1, o2 = pl.pallas_call(
        _selector_kernel,
        out_shape=(jax.ShapeDtypeStruct((B, 1, in_ch), jnp.float32),
                   jax.ShapeDtypeStruct((B, 1, in_ch), jnp.float32)),
        grid_spec=pltpu.PrefetchScalarGridSpec(
            num_scalar_prefetch=0,
            grid=(nb,),
            in_specs=[
                pl.BlockSpec((tb, C, H, W), lambda b: (b, 0, 0, 0)),
                pl.BlockSpec((W, SA), lambda b: (0, 0)),
                pl.BlockSpec((in_ch, hidden), lambda b: (0, 0)),
                pl.BlockSpec((hidden, in_ch), lambda b: (0, 0)),
                pl.BlockSpec((1, in_ch), lambda b: (0, 0)),
                pl.BlockSpec((hidden, in_ch), lambda b: (0, 0)),
                pl.BlockSpec((1, in_ch), lambda b: (0, 0)),
            ],
            out_specs=[
                pl.BlockSpec((tb, 1, in_ch), lambda b: (b, 0, 0)),
                pl.BlockSpec((tb, 1, in_ch), lambda b: (b, 0, 0)),
            ],
        ),
        compiler_params=pltpu.CompilerParams(
            dimension_semantics=("parallel",),
            vmem_limit_bytes=int(vmem_limit),
        ),
    )(x, binw, prepped["w1p"], prepped["w2a"], prepped["b2a"],
      prepped["w2b"], prepped["b2b"])

    att1 = o1.reshape(B, C, SA, SA)
    att2 = o2.reshape(B, C, SA, SA)
    return att1, att2


def selector_forward(x, prepped):
    """Full forward matching the PyTorch module: returns (B, C, H, W) maps."""
    B, C, H, W = x.shape
    att1, att2 = selector_forward_small(x, prepped)
    # F.interpolate(..., mode='nearest', integer scale) == exact repeat.
    # TODO(synk): end-to-end, prefer selector_forward_small + fusing this repeat
    # (and the downstream x * att apply) into the consumer — the two full-res
    # f32 maps written here dominate the Selector's HBM traffic.
    rh, rw = H // SA, W // SA
    att1 = jnp.repeat(jnp.repeat(att1, rh, axis=2), rw, axis=3)
    att2 = jnp.repeat(jnp.repeat(att2, rh, axis=2), rw, axis=3)
    return att1, att2


def selector_reference(x, params):
    """Pure-JAX reference mirroring the PyTorch forward."""
    B, C, H, W = x.shape
    pooled = x.reshape(B, C, SA, H // SA, SA, W // SA).mean(axis=(3, 5)).reshape(B, -1)
    y = jnp.maximum(pooled @ params["w_fc"].T, 0.0)
    a1 = y @ params["w_att1"].T + params["b_att1"]
    a2 = y @ params["w_att2"].T + params["b_att2"]
    att = jax.nn.softmax(jnp.stack([a1, a2]), axis=0)
    att1 = att[0].reshape(B, C, SA, SA)
    att2 = att[1].reshape(B, C, SA, SA)
    att1 = jnp.repeat(jnp.repeat(att1, H // SA, axis=2), W // SA, axis=3)
    att2 = jnp.repeat(jnp.repeat(att2, H // SA, axis=2), W // SA, axis=3)
    return att1, att2


def init_params(key, channel, reduction=16):
    in_ch = channel * SA * SA
    hidden = in_ch // reduction
    k1, k2, k3, k4, k5 = jax.random.split(key, 5)
    return {
        "w_fc":   0.1 * jax.random.normal(k1, (hidden, in_ch), jnp.float32),
        "w_att1": 0.1 * jax.random.normal(k2, (in_ch, hidden), jnp.float32),
        "b_att1": 0.1 * jax.random.normal(k3, (in_ch,), jnp.float32),
        "w_att2": 0.1 * jax.random.normal(k4, (in_ch, hidden), jnp.float32),
        "b_att2": 0.1 * jax.random.normal(k5, (in_ch,), jnp.float32),
    }


if __name__ == "__main__":
    key = jax.random.PRNGKey(0)
    kx, kp = jax.random.split(key)

    B, C, H, W = 2, 4, 16, 16      # channel=4 -> in_channel=64, hidden=4
    x = jax.random.normal(kx, (B, C, H, W), jnp.float32)
    params = init_params(kp, C, reduction=16)

    prepped = prepare_params(params)          # one-time weight prep, outside jit
    fwd = jax.jit(selector_forward)
    att1, att2 = fwd(x, prepped)
    jax.block_until_ready((att1, att2))

    r1, r2 = selector_reference(x, params)
    assert att1.shape == (B, C, H, W) and att2.shape == (B, C, H, W)
    assert jnp.allclose(att1, r1, atol=1e-5, rtol=1e-5)
    assert jnp.allclose(att2, r2, atol=1e-5, rtol=1e-5)
    assert jnp.allclose(att1 + att2, jnp.ones_like(att1), atol=1e-5)

    print("KERNEL_OK")
</pallas_src>

<mosaic_0001>
module attributes {stable_mosaic.version = 11 : i64} {
  func.func @_selector_kernel(%arg0: i32, %arg1: memref<1x4x16x16xf32, #tpu.memory_space<vmem>>, %arg2: memref<16x4xf32, #tpu.memory_space<vmem>>, %arg3: memref<64x4xf32, #tpu.memory_space<vmem>>, %arg4: memref<4x64xf32, #tpu.memory_space<vmem>>, %arg5: memref<1x64xf32, #tpu.memory_space<vmem>>, %arg6: memref<4x64xf32, #tpu.memory_space<vmem>>, %arg7: memref<1x64xf32, #tpu.memory_space<vmem>>, %arg8: memref<1x1x64xf32, #tpu.memory_space<vmem>>, %arg9: memref<1x1x64xf32, #tpu.memory_space<vmem>>) attributes {dimension_semantics = [#tpu.dimension_semantics<parallel>], iteration_bounds = array<i64: 2>, scalar_prefetch = 0 : i64, scratch_operands = 0 : i64, tpu.core_type = #tpu.core_type<tc>, window_params = [{transform_indices = @transform_0, window_bounds = array<i64: 1, 4, 16, 16>}, {pipeline_mode = #tpu.pipeline_mode<synchronous>, transform_indices = @transform_1, window_bounds = array<i64: 16, 4>}, {pipeline_mode = #tpu.pipeline_mode<synchronous>, transform_indices = @transform_2, window_bounds = array<i64: 64, 4>}, {pipeline_mode = #tpu.pipeline_mode<synchronous>, transform_indices = @transform_3, window_bounds = array<i64: 4, 64>}, {pipeline_mode = #tpu.pipeline_mode<synchronous>, transform_indices = @transform_4, window_bounds = array<i64: 1, 64>}, {pipeline_mode = #tpu.pipeline_mode<synchronous>, transform_indices = @transform_5, window_bounds = array<i64: 4, 64>}, {pipeline_mode = #tpu.pipeline_mode<synchronous>, transform_indices = @transform_6, window_bounds = array<i64: 1, 64>}, {transform_indices = @transform_7, window_bounds = array<i64: 1, 1, 64>}, {transform_indices = @transform_8, window_bounds = array<i64: 1, 1, 64>}]} {
    %c0 = arith.constant 0 : index
    %c0_0 = arith.constant 0 : index
    %c0_1 = arith.constant 0 : index
    %c0_2 = arith.constant 0 : index
    %0 = vector.load %arg1[%c0, %c0_0, %c0_1, %c0_2] : memref<1x4x16x16xf32, #tpu.memory_space<vmem>>, vector<1x4x16x16xf32>
    %1 = vector.shape_cast %0 : vector<1x4x16x16xf32> to vector<64x16xf32>
    %c0_3 = arith.constant 0 : index
    %c0_4 = arith.constant 0 : index
    %2 = vector.load %arg2[%c0_3, %c0_4] : memref<16x4xf32, #tpu.memory_space<vmem>>, vector<16x4xf32>
    %cst = arith.constant dense<0.000000e+00> : vector<64x4xf32>
    %3 = tpu.matmul %1, %2, %cst {dimension_numbers = #tpu.dot_dimension_numbers<[1], [0], [0], [1], [0, 0, 1, 1], [], []>} : vector<64x16xf32>, vector<16x4xf32>, vector<64x4xf32> -> vector<64x4xf32>
    %4 = vector.shape_cast %3 : vector<64x4xf32> to vector<1x4x16x4xf32>
    %5 = vector.extract_strided_slice %4 {offsets = [0, 0, 0, 0], sizes = [1, 4, 4, 4], strides = [1, 1, 1, 1]} : vector<1x4x16x4xf32> to vector<1x4x4x4xf32>
    %cst_5 = arith.constant dense<0.000000e+00> : vector<1x4x4xf32>
    %6 = vector.multi_reduction <add>, %5, %cst_5 [2] : vector<1x4x4x4xf32> to vector<1x4x4xf32>
    %7 = vector.extract_strided_slice %6 {offsets = [0, 0, 0], sizes = [1, 4, 1], strides = [1, 1, 1]} : vector<1x4x4xf32> to vector<1x4x1xf32>
    %cst_6 = arith.constant dense<0.000000e+00> : vector<1x4xf32>
    %8 = vector.multi_reduction <add>, %7, %cst_6 [2] : vector<1x4x1xf32> to vector<1x4xf32>
    %9 = vector.extract_strided_slice %6 {offsets = [0, 0, 1], sizes = [1, 4, 1], strides = [1, 1, 1]} : vector<1x4x4xf32> to vector<1x4x1xf32>
    %cst_7 = arith.constant dense<0.000000e+00> : vector<1x4xf32>
    %10 = vector.multi_reduction <add>, %9, %cst_7 [2] : vector<1x4x1xf32> to vector<1x4xf32>
    %11 = vector.extract_strided_slice %6 {offsets = [0, 0, 2], sizes = [1, 4, 1], strides = [1, 1, 1]} : vector<1x4x4xf32> to vector<1x4x1xf32>
    %cst_8 = arith.constant dense<0.000000e+00> : vector<1x4xf32>
    %12 = vector.multi_reduction <add>, %11, %cst_8 [2] : vector<1x4x1xf32> to vector<1x4xf32>
    %13 = vector.extract_strided_slice %6 {offsets = [0, 0, 3], sizes = [1, 4, 1], strides = [1, 1, 1]} : vector<1x4x4xf32> to vector<1x4x1xf32>
    %cst_9 = arith.constant dense<0.000000e+00> : vector<1x4xf32>
    %14 = vector.multi_reduction <add>, %13, %cst_9 [2] : vector<1x4x1xf32> to vector<1x4xf32>
    %15 = vector.extract_strided_slice %4 {offsets = [0, 0, 4, 0], sizes = [1, 4, 4, 4], strides = [1, 1, 1, 1]} : vector<1x4x16x4xf32> to vector<1x4x4x4xf32>
    %cst_10 = arith.constant dense<0.000000e+00> : vector<1x4x4xf32>
    %16 = vector.multi_reduction <add>, %15, %cst_10 [2] : vector<1x4x4x4xf32> to vector<1x4x4xf32>
    %17 = vector.extract_strided_slice %16 {offsets = [0, 0, 0], sizes = [1, 4, 1], strides = [1, 1, 1]} : vector<1x4x4xf32> to vector<1x4x1xf32>
    %cst_11 = arith.constant dense<0.000000e+00> : vector<1x4xf32>
    %18 = vector.multi_reduction <add>, %17, %cst_11 [2] : vector<1x4x1xf32> to vector<1x4xf32>
    %19 = vector.extract_strided_slice %16 {offsets = [0, 0, 1], sizes = [1, 4, 1], strides = [1, 1, 1]} : vector<1x4x4xf32> to vector<1x4x1xf32>
    %cst_12 = arith.constant dense<0.000000e+00> : vector<1x4xf32>
    %20 = vector.multi_reduction <add>, %19, %cst_12 [2] : vector<1x4x1xf32> to vector<1x4xf32>
    %21 = vector.extract_strided_slice %16 {offsets = [0, 0, 2], sizes = [1, 4, 1], strides = [1, 1, 1]} : vector<1x4x4xf32> to vector<1x4x1xf32>
    %cst_13 = arith.constant dense<0.000000e+00> : vector<1x4xf32>
    %22 = vector.multi_reduction <add>, %21, %cst_13 [2] : vector<1x4x1xf32> to vector<1x4xf32>
    %23 = vector.extract_strided_slice %16 {offsets = [0, 0, 3], sizes = [1, 4, 1], strides = [1, 1, 1]} : vector<1x4x4xf32> to vector<1x4x1xf32>
    %cst_14 = arith.constant dense<0.000000e+00> : vector<1x4xf32>
    %24 = vector.multi_reduction <add>, %23, %cst_14 [2] : vector<1x4x1xf32> to vector<1x4xf32>
    %25 = vector.extract_strided_slice %4 {offsets = [0, 0, 8, 0], sizes = [1, 4, 4, 4], strides = [1, 1, 1, 1]} : vector<1x4x16x4xf32> to vector<1x4x4x4xf32>
    %cst_15 = arith.constant dense<0.000000e+00> : vector<1x4x4xf32>
    %26 = vector.multi_reduction <add>, %25, %cst_15 [2] : vector<1x4x4x4xf32> to vector<1x4x4xf32>
    %27 = vector.extract_strided_slice %26 {offsets = [0, 0, 0], sizes = [1, 4, 1], strides = [1, 1, 1]} : vector<1x4x4xf32> to vector<1x4x1xf32>
    %cst_16 = arith.constant dense<0.000000e+00> : vector<1x4xf32>
    %28 = vector.multi_reduction <add>, %27, %cst_16 [2] : vector<1x4x1xf32> to vector<1x4xf32>
    %29 = vector.extract_strided_slice %26 {offsets = [0, 0, 1], sizes = [1, 4, 1], strides = [1, 1, 1]} : vector<1x4x4xf32> to vector<1x4x1xf32>
    %cst_17 = arith.constant dense<0.000000e+00> : vector<1x4xf32>
    %30 = vector.multi_reduction <add>, %29, %cst_17 [2] : vector<1x4x1xf32> to vector<1x4xf32>
    %31 = vector.extract_strided_slice %26 {offsets = [0, 0, 2], sizes = [1, 4, 1], strides = [1, 1, 1]} : vector<1x4x4xf32> to vector<1x4x1xf32>
    %cst_18 = arith.constant dense<0.000000e+00> : vector<1x4xf32>
    %32 = vector.multi_reduction <add>, %31, %cst_18 [2] : vector<1x4x1xf32> to vector<1x4xf32>
    %33 = vector.extract_strided_slice %26 {offsets = [0, 0, 3], sizes = [1, 4, 1], strides = [1, 1, 1]} : vector<1x4x4xf32> to vector<1x4x1xf32>
    %cst_19 = arith.constant dense<0.000000e+00> : vector<1x4xf32>
    %34 = vector.multi_reduction <add>, %33, %cst_19 [2] : vector<1x4x1xf32> to vector<1x4xf32>
    %35 = vector.extract_strided_slice %4 {offsets = [0, 0, 12, 0], sizes = [1, 4, 4, 4], strides = [1, 1, 1, 1]} : vector<1x4x16x4xf32> to vector<1x4x4x4xf32>
    %cst_20 = arith.constant dense<0.000000e+00> : vector<1x4x4xf32>
    %36 = vector.multi_reduction <add>, %35, %cst_20 [2] : vector<1x4x4x4xf32> to vector<1x4x4xf32>
    %37 = vector.extract_strided_slice %36 {offsets = [0, 0, 0], sizes = [1, 4, 1], strides = [1, 1, 1]} : vector<1x4x4xf32> to vector<1x4x1xf32>
    %cst_21 = arith.constant dense<0.000000e+00> : vector<1x4xf32>
    %38 = vector.multi_reduction <add>, %37, %cst_21 [2] : vector<1x4x1xf32> to vector<1x4xf32>
    %39 = vector.extract_strided_slice %36 {offsets = [0, 0, 1], sizes = [1, 4, 1], strides = [1, 1, 1]} : vector<1x4x4xf32> to vector<1x4x1xf32>
    %cst_22 = arith.constant dense<0.000000e+00> : vector<1x4xf32>
    %40 = vector.multi_reduction <add>, %39, %cst_22 [2] : vector<1x4x1xf32> to vector<1x4xf32>
    %41 = vector.extract_strided_slice %36 {offsets = [0, 0, 2], sizes = [1, 4, 1], strides = [1, 1, 1]} : vector<1x4x4xf32> to vector<1x4x1xf32>
    %cst_23 = arith.constant dense<0.000000e+00> : vector<1x4xf32>
    %42 = vector.multi_reduction <add>, %41, %cst_23 [2] : vector<1x4x1xf32> to vector<1x4xf32>
    %43 = vector.extract_strided_slice %36 {offsets = [0, 0, 3], sizes = [1, 4, 1], strides = [1, 1, 1]} : vector<1x4x4xf32> to vector<1x4x1xf32>
    %cst_24 = arith.constant dense<0.000000e+00> : vector<1x4xf32>
    %44 = vector.multi_reduction <add>, %43, %cst_24 [2] : vector<1x4x1xf32> to vector<1x4xf32>
    %45 = tpu.concatenate %8, %10, %12, %14, %18, %20, %22, %24, %28, %30, %32, %34, %38, %40, %42, %44 in 1 : vector<1x4xf32>, vector<1x4xf32>, vector<1x4xf32>, vector<1x4xf32>, vector<1x4xf32>, vector<1x4xf32>, vector<1x4xf32>, vector<1x4xf32>, vector<1x4xf32>, vector<1x4xf32>, vector<1x4xf32>, vector<1x4xf32>, vector<1x4xf32>, vector<1x4xf32>, vector<1x4xf32>, vector<1x4xf32> -> vector<1x64xf32>
    %c0_25 = arith.constant 0 : index
    %c0_26 = arith.constant 0 : index
    %46 = vector.load %arg3[%c0_25, %c0_26] : memref<64x4xf32, #tpu.memory_space<vmem>>, vector<64x4xf32>
    %cst_27 = arith.constant dense<0.000000e+00> : vector<1x4xf32>
    %47 = tpu.matmul %45, %46, %cst_27 {dimension_numbers = #tpu.dot_dimension_numbers<[1], [0], [0], [1], [0, 0, 1, 1], [], []>} : vector<1x64xf32>, vector<64x4xf32>, vector<1x4xf32> -> vector<1x4xf32>
    %cst_28 = arith.constant 0.000000e+00 : f32
    %48 = vector.broadcast %cst_28 : f32 to vector<1x4xf32>
    %49 = arith.maximumf %47, %48 : vector<1x4xf32>
    %c0_29 = arith.constant 0 : index
    %c0_30 = arith.constant 0 : index
    %50 = vector.load %arg4[%c0_29, %c0_30] : memref<4x64xf32, #tpu.memory_space<vmem>>, vector<4x64xf32>
    %cst_31 = arith.constant dense<0.000000e+00> : vector<1x64xf32>
    %51 = tpu.matmul %49, %50, %cst_31 {dimension_numbers = #tpu.dot_dimension_numbers<[1], [0], [0], [1], [0, 0, 1, 1], [], []>} : vector<1x4xf32>, vector<4x64xf32>, vector<1x64xf32> -> vector<1x64xf32>
    %c0_32 = arith.constant 0 : index
    %c0_33 = arith.constant 0 : index
    %52 = vector.load %arg5[%c0_32, %c0_33] : memref<1x64xf32, #tpu.memory_space<vmem>>, vector<1x64xf32>
    %53 = arith.addf %51, %52 : vector<1x64xf32>
    %c0_34 = arith.constant 0 : index
    %c0_35 = arith.constant 0 : index
    %54 = vector.load %arg6[%c0_34, %c0_35] : memref<4x64xf32, #tpu.memory_space<vmem>>, vector<4x64xf32>
    %cst_36 = arith.constant dense<0.000000e+00> : vector<1x64xf32>
    %55 = tpu.matmul %49, %54, %cst_36 {dimension_numbers = #tpu.dot_dimension_numbers<[1], [0], [0], [1], [0, 0, 1, 1], [], []>} : vector<1x4xf32>, vector<4x64xf32>, vector<1x64xf32> -> vector<1x64xf32>
    %c0_37 = arith.constant 0 : index
    %c0_38 = arith.constant 0 : index
    %56 = vector.load %arg7[%c0_37, %c0_38] : memref<1x64xf32, #tpu.memory_space<vmem>>, vector<1x64xf32>
    %57 = arith.addf %55, %56 : vector<1x64xf32>
    %58 = arith.subf %57, %53 : vector<1x64xf32>
    %59 = math.exp %58 : vector<1x64xf32>
    %cst_39 = arith.constant 1.000000e+00 : f32
    %60 = vector.broadcast %cst_39 : f32 to vector<1x64xf32>
    %61 = arith.addf %60, %59 : vector<1x64xf32>
    %62 = tpu.reciprocal %61 : vector<1x64xf32> -> vector<1x64xf32>
    %63 = vector.shape_cast %62 : vector<1x64xf32> to vector<1x1x64xf32>
    %c0_40 = arith.constant 0 : index
    %c0_41 = arith.constant 0 : index
    %c0_42 = arith.constant 0 : index
    %64 = vector.load %arg8[%c0_40, %c0_41, %c0_42] : memref<1x1x64xf32, #tpu.memory_space<vmem>>, vector<1x1x64xf32>
    tpu.vector_store %arg8[%c0_40, %c0_41, %c0_42], %63 {strides = array<i32>} : memref<1x1x64xf32, #tpu.memory_space<vmem>>, vector<1x1x64xf32>,
    %cst_43 = arith.constant 1.000000e+00 : f32
    %65 = vector.broadcast %cst_43 : f32 to vector<1x64xf32>
    %66 = arith.subf %65, %62 : vector<1x64xf32>
    %67 = vector.shape_cast %66 : vector<1x64xf32> to vector<1x1x64xf32>
    %c0_44 = arith.constant 0 : index
    %c0_45 = arith.constant 0 : index
    %c0_46 = arith.constant 0 : index
    %68 = vector.load %arg9[%c0_44, %c0_45, %c0_46] : memref<1x1x64xf32, #tpu.memory_space<vmem>>, vector<1x1x64xf32>
    tpu.vector_store %arg9[%c0_44, %c0_45, %c0_46], %67 {strides = array<i32>} : memref<1x1x64xf32, #tpu.memory_space<vmem>>, vector<1x1x64xf32>,
    return
  }
  func.func @transform_0(%arg0: i32) -> (i32, i32, i32, i32) {
    %c0_i32 = arith.constant 0 : i32
    %c0_i32_0 = arith.constant 0 : i32
    %c0_i32_1 = arith.constant 0 : i32
    %c0_i32_2 = arith.constant 0 : i32
    return %arg0, %c0_i32, %c0_i32_0, %c0_i32_1 : i32, i32, i32, i32
  }
  func.func @transform_1(%arg0: i32) -> (i32, i32) {
    %c0_i32 = arith.constant 0 : i32
    %c0_i32_0 = arith.constant 0 : i32
    %c0_i32_1 = arith.constant 0 : i32
    return %c0_i32, %c0_i32_0 : i32, i32
  }
  func.func @transform_2(%arg0: i32) -> (i32, i32) {
    %c0_i32 = arith.constant 0 : i32
    %c0_i32_0 = arith.constant 0 : i32
    %c0_i32_1 = arith.constant 0 : i32
    return %c0_i32, %c0_i32_0 : i32, i32
  }
  func.func @transform_3(%arg0: i32) -> (i32, i32) {
    %c0_i32 = arith.constant 0 : i32
    %c0_i32_0 = arith.constant 0 : i32
    %c0_i32_1 = arith.constant 0 : i32
    return %c0_i32, %c0_i32_0 : i32, i32
  }
  func.func @transform_4(%arg0: i32) -> (i32, i32) {
    %c0_i32 = arith.constant 0 : i32
    %c0_i32_0 = arith.constant 0 : i32
    %c0_i32_1 = arith.constant 0 : i32
    return %c0_i32, %c0_i32_0 : i32, i32
  }
  func.func @transform_5(%arg0: i32) -> (i32, i32) {
    %c0_i32 = arith.constant 0 : i32
    %c0_i32_0 = arith.constant 0 : i32
    %c0_i32_1 = arith.constant 0 : i32
    return %c0_i32, %c0_i32_0 : i32, i32
  }
  func.func @transform_6(%arg0: i32) -> (i32, i32) {
    %c0_i32 = arith.constant 0 : i32
    %c0_i32_0 = arith.constant 0 : i32
    %c0_i32_1 = arith.constant 0 : i32
    return %c0_i32, %c0_i32_0 : i32, i32
  }
  func.func @transform_7(%arg0: i32) -> (i32, i32, i32) {
    %c0_i32 = arith.constant 0 : i32
    %c0_i32_0 = arith.constant 0 : i32
    %c0_i32_1 = arith.constant 0 : i32
    return %arg0, %c0_i32, %c0_i32_0 : i32, i32, i32
  }
  func.func @transform_8(%arg0: i32) -> (i32, i32, i32) {
    %c0_i32 = arith.constant 0 : i32
    %c0_i32_0 = arith.constant 0 : i32
    %c0_i32_1 = arith.constant 0 : i32
    return %arg0, %c0_i32, %c0_i32_0 : i32, i32, i32
  }
}

</mosaic_0001>

<bundles_post_ra>
// kernel: selector_forward.1
= control target key start
LH: loop header
LB: loop body
LE: loop exit
PB: predicated region body
PF: predicated region fallthrough
CT: control target
= control target key end

     0   :  { %14 = vsyncpa [#allocation3], 0  ;;  %s1721_s0 = inlined_call_operand.hbm [shape: f32[2,4,16,16], index: 0, kind: input, shape index: {}]   ;;  %s1722_s1 = inlined_call_operand.vmem [shape: f32[16,4], index: 1, kind: input, shape index: {}]   ;;  %s1723_s2 = inlined_call_operand.vmem [shape: f32[64,4], index: 2, kind: input, shape index: {}]   ;;  %s1724_s3 = inlined_call_operand.vmem [shape: f32[4,64], index: 3, kind: input, shape index: {}]   ;;  %s1725_s4 = inlined_call_operand.vmem [shape: f32[1,64], index: 4, kind: input, shape index: {}]   ;;  %s1726_s5 = inlined_call_operand.vmem [shape: f32[4,64], index: 5, kind: input, shape index: {}]   ;;  %s1727_s6 = inlined_call_operand.vmem [shape: f32[1,64], index: 6, kind: input, shape index: {}]   ;;  %s1728_s7 = inlined_call_operand.vmem [shape: f32[2,1,64], index: 7, kind: output, shape index: {0}]   ;;  %s1729_s8 = inlined_call_operand.vmem [shape: f32[2,1,64], index: 8, kind: output, shape index: {1}]  }
   0x1   :  { %16 = vsyncpa [#allocation3 + $0x1], 0  ;;  %s1456_s27 = smov 0   ;;  %s1458_s28 = smov 0  }
   0x2   :  { %s1460_s29 = smov 0   ;;  %s1462_s30 = smov 0  }
   0x3 LB: > { %s1475_s9 = sadd.s32 4294967295, %s1399_s30   ;;  %s1478_s10 = sadd.s32 1, %s1399_s30   ;;  %s1399_s30 = sphi %s1462_s30, %s1736_s30   ;;  %s1395_s29 = sphi %s1460_s29, %s1735_s29   ;;  %s1391_s28 = sphi %s1458_s28, %s1734_s28   ;;  %s1387_s27 = sphi %s1456_s27, %s1733_s27  }
   0x4   : > { %s26_s11 = ssub.s32 %s1399_s30, %s1478_s10  ;;  %s29_s12 = sadd.s32 1, %s1395_s29 }
   0x5   : > { %p27_p0 = scmp.eq.s32.totalorder %s26_s11, 0  ;;  %p36_p1 = scmp.ne.s32.totalorder %s1395_s29, %s1391_s28 }
   0x6   : > { %p37_p2 = scmp.eq.s32.totalorder %s1399_s30, 0  ;;  %p42_p3 = scmp.ne.s32.totalorder %s1391_s28, %s1387_s27 }
   0x7   : > { %s1488_s13 = scalar_select %p27_p0, %s1395_s29, %s29_s12  }
   0x8   : > { %p38_p4 = por %p37_p2, %p36_p1  ;;  %p43_p5 = scmp.eq.s32.totalorder %s1475_s9, 0 }
   0x9   : > { %p1273_p6 = scmp.lt.s32.totalorder %s1399_s30, 2  ;;  %s262_s15 = sand.u32 1, %s1395_s29  }
   0xa   : > { %p1492_p7 = por %p43_p5, %p42_p3  ;;  %s1162_s16 = sshll.u32 %s262_s15, 6 }
   0xb   : > { %s1182_s17 = sshll.u32 %s1399_s30, 10  ;;  %s266_s21 = scalar_lea.vmem [#allocation2], %s1162_s16 }
   0xc   : > { %s1501_s20 = scalar_lea.hbm %s1721_s0, %s1182_s17  ;;  %s273_s22 = sshll.u32 %s266_s21, 4  ;;  %s1503_s22 = int_to_ptr.vmem [resolvable:$true] %s273_s22 }
   0xd   : > { %p1505_p8 = pnand %p1273_p6, %p38_p4  ;;  %s1510_s24 = scalar_lea.sflag [#allocation3], %s262_s15 }
   0xe   : > { %s1335_s25 = scalar_lea.hbm %s1501_s20, 1024  ;;  %s1340_s11 = scalar_lea.hbm %s1721_s0, 2048 }
   0xf   : > { %p1336_p10 = scmp.ne.s32.totalorder %s1501_s20, %s1335_s25  ;;  %p1337_p11 = pneg %p1505_p8 }
  0x10   : > { %p1341_p0 = scmp.lt.u32.totalorder %s1501_s20, %s1721_s0  ;;  %p1342_p1 = scmp.lt.u32.totalorder %s1340_s11, %s1335_s25 }
  0x11   : > { %p1338_p12 = pnand %p1337_p11, %p1336_p10  ;;  %p1344_p3 = scmp.lt.u32.totalorder %s1335_s25, %s1501_s20 }
  0x12   : > { %p1343_p2 = por %p1342_p1, %p1341_p0 }
  0x13   : > { %p1339_p13 = pneg %p1338_p12 }
  0x14   : > { %p1345_p4 = por %p1344_p3, %p1343_p2 }
  0x16   : > { %p1346_p5 = pnand %p1345_p4, %p1339_p13 }
  0x18   : > { %1349 = shalt.err (!%p1346_p5)
}
  0x19   : > { %s1350_s15 = scalar_lea.vmem %s1503_s22, 1024  ;;  %s1401_s17 = smov [#allocation2]  }
  0x1a   : > { %p1351_p6 = scmp.ne.s32.totalorder %s1503_s22, %s1350_s15  ;;  %s1355_s18 = sshll.u32 %s1401_s17, 4  ;;  %s1356_s18 = int_to_ptr.vmem [resolvable:$false] %s1355_s18 }
  0x1b   : > { %s1357_s19 = scalar_lea.vmem %s1356_s18, 2048  ;;  %p1358_p9 = scmp.lt.s32.totalorder %s1503_s22, %s1356_s18 }
  0x1c   : > { %p1353_p10 = pnand %p1351_p6, %p1337_p11  ;;  %p1359_p0 = scmp.lt.s32.totalorder %s1357_s19, %s1350_s15 }
  0x1e   : > { %p1354_p12 = pneg %p1353_p10  ;;  %p1360_p1 = por %p1359_p0, %p1358_p9 }
  0x20   : > { %p1361_p2 = pnand %p1360_p1, %p1354_p12 }
  0x22   : > { %1364 = shalt.err (!%p1361_p2)
}
  0x23   : > { %s1402_s21 = smov 128   ;;  %s1403_s25 = smov 8  }
  0x24   : > { %1272 = dma.hbm_to_vmem [thread:$0]  (!%p1505_p8), %s1501_s20, 1024, %s1503_s22, %s1510_s24, %s1402_s21, %s1402_s21, %s1403_s25  }
  0x25   : > { %p281_p11 = scmp.lt.s32.totalorder %s1399_s30, 3  ;;  %p1732_p13 = scmp.ge.s32.totalorder %s1399_s30, 1 }
  0x27   : > { %p282_p3 = pnand %p1732_p13, %p281_p11 }
  0x28   : > { %s287_s26 = sand.u32 (!%p282_p3), 1, %s1391_s28  }
  0x29   : > { %285 = sbr.rel (%p282_p3) target bundleno = 935 (0x3a7), region = 48  ;;  %s1166_s27 = sshll.u32 (!%p282_p3), %s287_s26, 6 }
  0x2a   : > { %s288_s11 = scalar_lea.sflag (!%p282_p3), [#allocation3], %s287_s26  ;;  %s291_s12 = scalar_lea.vmem (!%p282_p3), [#allocation2], %s1166_s27 }
  0x30   : > { %1382 = dma.done.wait (%p1492_p7), %s288_s11, 1024  }
  0x31   : > { %1384 = vsyncadd (%p1492_p7), %s288_s11, 4294966272  ;;  %vm341_vm0 = vcmask 130048   ;;  %v339_v0 = vld [vmem:[%s1722_s1] sm:$0xff]  ;;  %v340_v1 = vld [vmem:[%s1722_s1 + $0x8] sm:$0xff]  ;;  %v1404_v11 = vmov 2   ;;  %v1405_v12 = vmov 0  }
  0x32   : > { %v331_v2 = vld [vmem:[%s291_s12] sm:$0xff]  ;;  %v1251_v3 = vpack.c.bf16 %v340_v1, %v339_v0  ;;  %v332_v4 = vld [vmem:[%s291_s12 + $0x8] sm:$0xff]  ;;  %v333_v5 = vld [vmem:[%s291_s12 + $0x10] sm:$0xff]  ;;  %1317 = vset.pattern.permute.xlu0 %v1404_v11  ;;  %1315 = vset.pattern.permute.xlu1 %v1405_v12  ;;  %vm471_vm1 = vcmask 27648   ;;  %vm628_vm2 = vcmask 1041409   ;;  %vm630_vm3 = vcmask 1042434  }
  0x33   : > { %1210 = vmatprep.mubr.msk.f32.mxu0 %vm341_vm0, %v331_v2  ;;  %v334_v6 = vld [vmem:[%s291_s12 + $0x18] sm:$0xff]  ;;  %v335_v7 = vld [vmem:[%s291_s12 + $0x20] sm:$0xff]  ;;  %v336_v8 = vld [vmem:[%s291_s12 + $0x28] sm:$0xff]  ;;  %vm632_vm4 = vcmask 1043459   ;;  %vm1409_vm5 = vmmov 0   ;;  %vm917_vm6 = vcmask 1043456  }
  0x34   : > { %1252 = vmatprep.subr.bf16.mxu0 %v1251_v3  ;;  %v337_v9 = vld [vmem:[%s291_s12 + $0x30] sm:$0xff]  ;;  %v338_v10 = vld [vmem:[%s291_s12 + $0x38] sm:$0xff]  ;;  %vm800_vm7 = vcmask 31744   ;;  %vm802_vm8 = vcmask 64512   ;;  %vm804_vm9 = vcmask 97280   ;;  %vm807_vm10 = vcmask 162816  }
  0x35   : > { %1254 = vmatpush3.bf16.msra.mxu0 %v1251_v3  ;;  %vm809_vm11 = vcmask 195584   ;;  %vm811_vm12 = vcmask 228352   ;;  %vm813_vm13 = vcmask 261120   ;;  %vm815_vm14 = vcmask 293888   ;;  %p325_p7 = scmp.lt.s32.totalorder %s1475_s9, 1 }
  0x36   : > { %vm817_vm15 = vcmask 326656  }
  0x37   : > { %s1738_s9 = smov (!%p325_p7, %s1475_s9), 1 }
  0x38   : > { %1211 = vmatmul.mubr.msk.f32.vlgmr.msra.gmra.mrb[0].mxu0 %vm341_vm0, %v332_v4  ;;  %s327_s26 = scalar_lea.vmem %s1728_s7, %s1738_s9  ;;  %s330_s12 = scalar_lea.vmem %s1729_s8, %s1738_s9 }
  0x39   : > { %1213 = vmatprep.mubr.msk.f32.mxu0 %vm341_vm0, %v333_v5 }
  0x3c   : > { %1214 = vmatmul.mubr.msk.f32.gmra.mrb[2].mxu0 %vm341_vm0, %v334_v6 }
  0x3d   : > { %1216 = vmatprep.mubr.msk.f32.mxu0 %vm341_vm0, %v335_v7 }
  0x40   : > { %1217 = vmatmul.mubr.msk.f32.gmra.mrb[4].mxu0 %vm341_vm0, %v336_v8 }
  0x41   : > { %1219 = vmatprep.mubr.msk.f32.mxu0 %vm341_vm0, %v337_v9 }
  0x44   : > { %1220 = vmatmul.mubr.msk.f32.gmra.mrb[6].mxu0 %vm341_vm0, %v338_v10 }
 0x10b   : > { %v1212_v13 = vpop.f32.mrb[0].mxu0 }
 0x10c   : > { %v548_v14 = vsel %vm471_vm1, %v1212_v13, 0.0  ;;  %v584_v15 = vrot.slane %v1212_v13, 4  ;;  %v432_v16 = vpop.f32.mrb[1].mxu0 }
 0x10d   : > { %v549_v17 = vrot.slane %v548_v14, 4  ;;  %v472_v18 = vsel %vm471_vm1, %v432_v16, 0.0  ;;  %v508_v19 = vrot.slane %v432_v16, 4 }
 0x10e   : > { %v592_v20 = vsel %vm471_vm1, %v584_v15, 0.0  ;;  %v473_v21 = vrot.slane %v472_v18, 4 }
 0x10f   : > { %v550_v22 = vadd.f32 %v549_v17, %v548_v14  ;;  %v593_v23 = vrot.slane %v592_v20, 4  ;;  %v516_v24 = vsel %vm471_vm1, %v508_v19, 0.0  ;;  %v1215_v25 = vpop.f32.mrb[2].mxu0 }
 0x110   : > { %v474_v26 = vadd.f32 %v473_v21, %v472_v18  ;;  %v517_v27 = vrot.slane %v516_v24, 4  ;;  %v555_v28 = vsel %vm471_vm1, %v1215_v25, 0.0  ;;  %v585_v29 = vrot.slane %v1215_v25, 4  ;;  %v442_v30 = vpop.f32.mrb[3].mxu0 }
 0x111   : > { %v551_v31 = vrot.slane %v550_v22, 2  ;;  %v594_v32 = vadd.f32 %v593_v23, %v592_v20  ;;  %v556_v33 = vrot.slane %v555_v28, 4  ;;  %v479_v34 = vsel %vm471_vm1, %v442_v30, 0.0 }
 0x112   : > { %v475_v35 = vrot.slane %v474_v26, 2  ;;  %v518_v36 = vadd.f32 %v517_v27, %v516_v24  ;;  %v599_v37 = vsel %vm471_vm1, %v585_v29, 0.0  ;;  %v480_v38 = vrot.slane %v479_v34, 4 }
 0x113   : > { %v552_v39 = vadd.f32 %v551_v31, %v550_v22  ;;  %v595_v40 = vrot.slane %v594_v32, 2  ;;  %v557_v41 = vadd.f32 %v556_v33, %v555_v28  ;;  %v600_v42 = vrot.slane %v599_v37, 4  ;;  %v1218_v43 = vpop.f32.mrb[4].mxu0 }
 0x114   : > { %v476_v44 = vadd.f32 %v475_v35, %v474_v26  ;;  %v519_v45 = vrot.slane %v518_v36, 2  ;;  %v481_v46 = vadd.f32 %v480_v38, %v479_v34  ;;  %v509_v47 = vrot.slane %v442_v30, 4  ;;  %v452_v48 = vpop.f32.mrb[5].mxu0 }
 0x115   : > { %v553_v49 = vrot.slane %v552_v39, 1  ;;  %v596_v50 = vadd.f32 %v595_v40, %v594_v32  ;;  %v558_v51 = vrot.slane %v557_v41, 2  ;;  %v601_v52 = vadd.f32 %v600_v42, %v599_v37 }
 0x116   : > { %v477_v53 = vrot.slane %v476_v44, 1  ;;  %v520_v54 = vadd.f32 %v519_v45, %v518_v36  ;;  %v482_v55 = vrot.slane %v481_v46, 2  ;;  %v523_v56 = vsel %vm471_vm1, %v509_v47, 0.0 }
 0x117   : > { %v1570_v57 = vadd.f32 %v553_v49, %v552_v39  ;;  %v597_v58 = vrot.slane %v596_v50, 1  ;;  %v559_v59 = vadd.f32 %v558_v51, %v557_v41  ;;  %v602_v60 = vrot.slane %v601_v52, 2  ;;  %v1221_v61 = vpop.f32.mrb[6].mxu0 }
 0x118   : > { %v1572_v62 = vadd.f32 %v477_v53, %v476_v44  ;;  %v521_v63 = vrot.slane %v520_v54, 1  ;;  %v483_v0 = vadd.f32 %v482_v55, %v481_v46  ;;  %v524_v1 = vrot.slane %v523_v56, 4  ;;  %v462_v2 = vpop.f32.mrb[7].mxu0 }
 0x119   : > { %v1574_v3 = vadd.f32 %v597_v58, %v596_v50  ;;  %v560_v4 = vrot.slane %v559_v59, 1  ;;  %v603_v5 = vadd.f32 %v602_v60, %v601_v52  ;;  %v562_v6 = vsel %vm471_vm1, %v1218_v43, 0.0 }
 0x11a   : > { %v1577_v7 = vadd.f32 %v521_v63, %v520_v54  ;;  %v484_v8 = vrot.slane %v483_v0, 1  ;;  %v525_v9 = vadd.f32 %v524_v1, %v523_v56  ;;  %v563_v10 = vrot.slane %v562_v6, 4 }
 0x11b   : > { %v561_v13 = vadd.f32 %v560_v4, %v559_v59  ;;  %v604_v14 = vrot.slane %v603_v5, 1  ;;  %v586_v15 = vrot.slane %v1218_v43, 4  ;;  %v486_v16 = vsel %vm471_vm1, %v452_v48, 0.0 }
 0x11c   : > { %v485_v17 = vadd.f32 %v484_v8, %v483_v0  ;;  %v526_v18 = vrot.slane %v525_v9, 2  ;;  %v564_v19 = vadd.f32 %v563_v10, %v562_v6  ;;  %v487_v20 = vrot.slane %v486_v16, 4 }
 0x11d   : > { %v605_v21 = vadd.f32 %v604_v14, %v603_v5  ;;  %v606_v22 = vsel %vm471_vm1, %v586_v15, 0.0  ;;  %v510_v23 = vrot.slane %v452_v48, 4  ;;  %v569_v24 = vsel %vm471_vm1, %v1221_v61, 0.0 }
 0x11e   : > { %v527_v25 = vadd.f32 %v526_v18, %v525_v9  ;;  %v565_v26 = vrot.slane %v564_v19, 2  ;;  %v607_v27 = vrot.slane %v606_v22, 4  ;;  %v488_v28 = vadd.f32 %v487_v20, %v486_v16 }
 0x11f   : > { %v530_v29 = vsel %vm471_vm1, %v510_v23, 0.0  ;;  %v570_v30 = vrot.slane %v569_v24, 4  ;;  %v587_v31 = vrot.slane %v1221_v61, 4  ;;  %v493_v32 = vsel %vm471_vm1, %v462_v2, 0.0 }
 0x120   : > { %v528_v33 = vrot.slane %v527_v25, 1  ;;  %v566_v34 = vadd.f32 %v565_v26, %v564_v19  ;;  %v608_v35 = vadd.f32 %v607_v27, %v606_v22  ;;  %v489_v36 = vrot.slane %v488_v28, 2 }
 0x121   : > { %v531_v37 = vrot.slane %v530_v29, 4  ;;  %v571_v38 = vadd.f32 %v570_v30, %v569_v24  ;;  %v613_v39 = vsel %vm471_vm1, %v587_v31, 0.0  ;;  %v494_v40 = vrot.slane %v493_v32, 4  ;;  %v829_v31 = vld [vmem:[%s1723_s2] sm:$0xff] }
 0x122   : > { %v529_v41 = vadd.f32 %v528_v33, %v527_v25  ;;  %v567_v42 = vrot.slane %v566_v34, 1  ;;  %v609_v43 = vrot.slane %v608_v35, 2  ;;  %v490_v44 = vadd.f32 %v489_v36, %v488_v28 }
 0x123   : > { %v532_v45 = vadd.f32 %v531_v37, %v530_v29  ;;  %v572_v46 = vrot.slane %v571_v38, 2  ;;  %v614_v47 = vrot.slane %v613_v39, 4  ;;  %v495_v48 = vadd.f32 %v494_v40, %v493_v32  ;;  %v830_v32 = vld [vmem:[%s1723_s2 + $0x8] sm:$0xff]  ;;  %v833_v37 = vld [vmem:[%s1723_s2 + $0x20] sm:$0xff]  ;;  %v836_v40 = vld [vmem:[%s1723_s2 + $0x38] sm:$0xff] }
 0x124   : > { %v568_v49 = vadd.f32 %v567_v42, %v566_v34  ;;  %v610_v50 = vadd.f32 %v609_v43, %v608_v35  ;;  %v491_v51 = vrot.slane %v490_v44, 1  ;;  %v511_v52 = vrot.slane %v462_v2, 4  ;;  %v831_v35 = vld [vmem:[%s1723_s2 + $0x10] sm:$0xff]  ;;  %v912_v43 = vld [vmem:[%s1724_s3] sm:$0xf] }
 0x125   : > { %v533_v53 = vrot.slane %v532_v45, 2  ;;  %v573_v54 = vadd.f32 %v572_v46, %v571_v38  ;;  %v615_v55 = vadd.f32 %v614_v47, %v613_v39  ;;  %v496_v56 = vrot.slane %v495_v48, 2  ;;  %v834_v38 = vld [vmem:[%s1723_s2 + $0x28] sm:$0xff] }
 0x126   : > { %v611_v58 = vrot.slane %v610_v50, 1  ;;  %v492_v59 = vadd.f32 %v491_v51, %v490_v44  ;;  %v537_v60 = vsel %vm471_vm1, %v511_v52, 0.0  ;;  %v718_v61 = vsel %vm628_vm2, %v561_v13, %v1570_v57 }
 0x127   : > { %v534_v63 = vadd.f32 %v533_v53, %v532_v45  ;;  %v574_v0 = vrot.slane %v573_v54, 1  ;;  %v616_v1 = vrot.slane %v615_v55, 2  ;;  %v497_v4 = vadd.f32 %v496_v56, %v495_v48 }
 0x128   : > { %v612_v5 = vadd.f32 %v611_v58, %v610_v50  ;;  %v538_v6 = vrot.slane %v537_v60, 4  ;;  %v719_v8 = vsel %vm630_vm3, %v568_v49, %v718_v61  ;;  %v629_v2 = vsel %vm628_vm2, %v485_v17, %v1572_v62 }
 0x129   : > { %v535_v9 = vrot.slane %v534_v63, 1  ;;  %v575_v10 = vadd.f32 %v574_v0, %v573_v54  ;;  %v617_v14 = vadd.f32 %v616_v1, %v615_v55  ;;  %v498_v15 = vrot.slane %v497_v4, 1 }
 0x12a   : > { %v539_v16 = vadd.f32 %v538_v6, %v537_v60  ;;  %v631_v18 = vsel %vm630_vm3, %v492_v59, %v629_v2  ;;  %v675_v57 = vsel %vm628_vm2, %v529_v41, %v1577_v7  ;;  %v761_v13 = vsel %vm628_vm2, %v605_v21, %v1574_v3 }
 0x12b   : > { %v536_v19 = vadd.f32 %v535_v9, %v534_v63  ;;  %v618_v20 = vrot.slane %v617_v14, 1  ;;  %v499_v22 = vadd.f32 %v498_v15, %v497_v4  ;;  %v720_v23 = vsel %vm632_vm4, %v575_v10, %v719_v8 }
 0x12c   : > { %v540_v24 = vrot.slane %v539_v16, 2  ;;  %740 = vperm.xlu0 %1317, %v720_v23   ;;  %722 = vperm.xlu1 %1315, %v720_v23   ;;  %v762_v62 = vsel %vm630_vm3, %v612_v5, %v761_v13  ;;  %v1406_v3 = vmov 1   ;;  %v1407_v30 = vmov 3  }
 0x12d   : > { %v633_v17 = vsel %vm632_vm4, %v499_v22, %v631_v18  ;;  %v676_v25 = vsel %vm630_vm3, %v536_v19, %v675_v57  ;;  %v619_v26 = vadd.f32 %v618_v20, %v617_v14  ;;  %v1408_v33 = vmov 0.0|0.0  }
 0x12e   : > { %v541_v27 = vadd.f32 %v540_v24, %v539_v16  ;;  %1255 = vmatprep.subr.bf16.mxu1 %v1408_v33  ;;  %v1256_v34 = vpack.c.bf16 %v830_v32, %v829_v31  ;;  %v1262_v39 = vpack.c.bf16 %v834_v38, %v833_v37  ;;  %v1410_v42 = vmov 0.0  }
 0x12f   : > { %v763_v7 = vsel %vm632_vm4, %v619_v26, %v762_v62  ;;  %1238 = vmatprep.mubr.msk.f32.mxu1 %vm1409_vm5, %v1410_v42  ;;  %1241 = vmatprep.subr.mxu0 %v1410_v42  ;;  %v637_v47 = vlaneseq  ;;  %vm821_vm1 = vcmask 392192   ;;  %vm823_vm2 = vcmask 424960  }
 0x130   : > { %v542_v28 = vrot.slane %v541_v27, 1  ;;  %1319 = vset.pattern.permute.xlu0 %v1405_v12  ;;  %1316 = vset.pattern.permute.xlu1 %v1406_v3  ;;  %vm825_vm3 = vcmask 457728  }
 0x131   : > { %731 = vperm.xlu1 %1316, %v720_v23   ;;  %635 = vperm.xlu0 %1319, %v633_v17   ;;  %v1646_v50 = vand.u32 127, %v637_v47  ;;  %v1650_v54 = vshrl.u32 %v637_v47, 7 }
 0x132   : > { %v543_v21 = vadd.f32 %v542_v28, %v541_v27  ;;  %1257 = vmatpush3.bf16.msra.mxu1 %v1256_v34  ;;  %1243 = vmatprep.mubr.msk.f32.mxu0 %vm1409_vm5, %v1410_v42 }
 0x133   : > { %1258 = vmatprep.subr.bf16.mxu1 %v1408_v33  ;;  %1242 = vmatpush3.msk.msra.mxu0 %vm917_vm6, %v912_v43  ;;  %v647_v51 = vadd.s32 4294967292, %v1646_v50  ;;  %v656_v52 = vadd.s32 4294967288, %v1646_v50  ;;  %v665_v55 = vadd.s32 4294967284, %v1646_v50  ;;  %v681_v59 = vadd.s32 4294967280, %v1646_v50 }
 0x134   : > { %v677_v29 = vsel %vm632_vm4, %v543_v21, %v676_v25  ;;  %v641_v61 = vsub.s32 %v1646_v50, %v1650_v54  ;;  %v690_v4 = vadd.s32 4294967276, %v1646_v50  ;;  %v699_v2 = vadd.s32 4294967272, %v1646_v50 }
 0x135   : > { %1318 = vset.pattern.permute.xlu1 %v1407_v30  ;;  %1320 = vset.pattern.permute.xlu0 %v1406_v3  ;;  %v650_v58 = vsub.s32 %v647_v51, %v1650_v54  ;;  %v659_v60 = vsub.s32 %v656_v52, %v1650_v54  ;;  %v668_v63 = vsub.s32 %v665_v55, %v1650_v54  ;;  %v708_v10 = vadd.s32 4294967268, %v1646_v50 }
 0x136   : > { %749 = vperm.xlu1 %1318, %v720_v23   ;;  %645 = vperm.xlu0 %1320, %v633_v17   ;;  %v684_v5 = vsub.s32 %v681_v59, %v1650_v54  ;;  %v724_v15 = vadd.s32 4294967264, %v1646_v50  ;;  %v733_v18 = vadd.s32 4294967260, %v1646_v50  ;;  %v693_v13 = vsub.s32 %v690_v4, %v1650_v54 }
 0x137   : > { %v742_v20 = vadd.s32 4294967256, %v1646_v50  ;;  %v702_v23 = vsub.s32 %v699_v2, %v1650_v54  ;;  %v711_v24 = vsub.s32 %v708_v10, %v1650_v54  ;;  %vm827_vm4 = vcmask 490496  }
 0x138   : > { %v736_v27 = vsub.s32 %v733_v18, %v1650_v54 }
 0x139   : > { %v745_v21 = vsub.s32 %v742_v20, %v1650_v54 }
 0x13a   : > { %1321 = vset.pattern.permute.xlu1 %v1404_v11  ;;  %688 = vperm.xlu0 %1320, %v677_v29  }
 0x13b   : > { %654 = vperm.xlu1 %1321, %v633_v17  }
 0x13e   : > { %1326 = vset.pattern.permute.xlu0 %v1407_v30 }
 0x13f   : > { %1322 = vset.pattern.permute.xlu1 %v1407_v30  ;;  %706 = vperm.xlu0 %1326, %v677_v29  }
 0x140   : > { %663 = vperm.xlu1 %1322, %v633_v17   ;;  %v727_v17 = vsub.s32 %v724_v15, %v1650_v54 }
 0x143   : > { %1327 = vset.pattern.permute.xlu0 %v1406_v3 }
 0x144   : > { %1323 = vset.pattern.permute.xlu1 %v1405_v12  ;;  %774 = vperm.xlu0 %1327, %v763_v7  }
 0x145   : > { %679 = vperm.xlu1 %1323, %v677_v29  }
 0x148   : > { %1330 = vset.pattern.permute.xlu0 %v1407_v30 }
 0x149   : > { %1324 = vset.pattern.permute.xlu1 %v1404_v11 }
 0x14a   : > { %697 = vperm.xlu1 %1324, %v677_v29  }
 0x14e   : > { %1325 = vset.pattern.permute.xlu1 %v1405_v12  ;;  %v832_v12 = vld [vmem:[%s1723_s2 + $0x18] sm:$0xff] }
 0x14f   : > { %765 = vperm.xlu1 %1325, %v763_v7   ;;  %v1259_v36 = vpack.c.bf16 %v832_v12, %v831_v35 }
 0x151   : > { %1260 = vmatpush3.bf16.msra.mxu1 %v1259_v36 }
 0x152   : > { %1261 = vmatprep.subr.bf16.mxu1 %v1408_v33 }
 0x153   : > { %1328 = vset.pattern.permute.xlu1 %v1404_v11  ;;  %v835_v11 = vld [vmem:[%s1723_s2 + $0x30] sm:$0xff] }
 0x154   : > { %783 = vperm.xlu1 %1328, %v763_v7   ;;  %v1265_v41 = vpack.c.bf16 %v836_v40, %v835_v11  ;;  %v785_v40 = vadd.s32 4294967240, %v1646_v50 }
 0x155   : > { %1263 = vmatpush3.bf16.msra.mxu1 %v1262_v39 }
 0x156   : > { %1264 = vmatprep.subr.bf16.mxu1 %v1408_v33  ;;  %v788_v51 = vsub.s32 %v785_v40, %v1650_v54 }
 0x158   : > { %1329 = vset.pattern.permute.xlu1 %v1407_v30  ;;  %v767_v30 = vadd.s32 4294967248, %v1646_v50 }
 0x159   : > { %792 = vperm.xlu1 %1329, %v763_v7   ;;  %1266 = vmatpush3.bf16.msra.mxu1 %v1265_v41  ;;  %v751_v7 = vadd.s32 4294967252, %v1646_v50  ;;  %v776_v41 = vadd.s32 4294967244, %v1646_v50 }
 0x15a   : > { %1246 = vmatprep.subr.mxu1 %v1410_v42  ;;  %v770_v39 = vsub.s32 %v767_v30, %v1650_v54 }
 0x15b   : > { %v754_v12 = vsub.s32 %v751_v7, %v1650_v54 }
 0x1ab   : > { %v723_v44 = vpop.permute.xlu1 %722  ;;  %v1642_v45 = vpop.permute.xlu0 %740 }
 0x1ac   : > { %v728_v33 = vrot.slane %v723_v44, %v727_v17  ;;  %v746_v37 = vrot.slane %v1642_v45, %v745_v21  ;;  %v779_v45 = vsub.s32 %v776_v41, %v1650_v54 }
 0x1b0   : > { %v732_v46 = vpop.permute.xlu1 %731  ;;  %v636_v49 = vpop.permute.xlu0 %635 }
 0x1b1   : > { %v642_v9 = vrot.slane %v636_v49, %v641_v61  ;;  %v737_v35 = vrot.slane %v732_v46, %v736_v27  ;;  %v794_v46 = vadd.s32 4294967236, %v1646_v50 }
 0x1b5   : > { %v1644_v48 = vpop.permute.xlu1 %749  ;;  %v646_v56 = vpop.permute.xlu0 %645 }
 0x1b6   : > { %v651_v1 = vrot.slane %v646_v56, %v650_v58  ;;  %v755_v47 = vrot.slane %v1644_v48, %v754_v12  ;;  %v797_v56 = vsub.s32 %v794_v46, %v1650_v54 }
 0x1b8   : > { %v801_v57 = vsel %vm800_vm7, %v642_v9, %v651_v1 }
 0x1b9   : > { %v689_v6 = vpop.permute.xlu0 %688 }
 0x1ba   : > { %v655_v53 = vpop.permute.xlu1 %654  ;;  %v694_v28 = vrot.slane %v689_v6, %v693_v13  ;;  %v913_v6 = vld [vmem:[%s1725_s4] sm:$0x1] }
 0x1bb   : > { %v660_v8 = vrot.slane %v655_v53, %v659_v60 }
 0x1bd   : > { %v803_v22 = vsel %vm802_vm8, %v801_v57, %v660_v8  ;;  %vm837_vm8 = vcmask 523264   ;;  %v992_v8 = vld [vmem:[%s1727_s6] sm:$0x1] }
 0x1be   : > { %v707_v25 = vpop.permute.xlu0 %706 }
 0x1bf   : > { %v664_v0 = vpop.permute.xlu1 %663  ;;  %v712_v31 = vrot.slane %v707_v25, %v711_v24 }
 0x1c0   : > { %v669_v14 = vrot.slane %v664_v0, %v668_v63  ;;  %v991_v0 = vld [vmem:[%s1726_s5] sm:$0xf] }
 0x1c2   : > { %v805_v62 = vsel %vm804_vm9, %v803_v22, %v669_v14 }
 0x1c3   : > { %v775_v55 = vpop.permute.xlu0 %774 }
 0x1c4   : > { %v680_v16 = vpop.permute.xlu1 %679  ;;  %v780_v60 = vrot.slane %v775_v55, %v779_v45 }
 0x1c5   : > { %v685_v19 = vrot.slane %v680_v16, %v684_v5 }
 0x1c7   : > { %v806_v26 = vsel %vm341_vm0, %v805_v62, %v685_v19  ;;  %vm819_vm0 = vcmask 359424  }
 0x1c8   : > { %v808_v32 = vsel %vm807_vm10, %v806_v26, %v694_v28 }
 0x1c9   : > { %v698_v3 = vpop.permute.xlu1 %697 }
 0x1ca   : > { %v703_v29 = vrot.slane %v698_v3, %v702_v23 }
 0x1cc   : > { %v810_v34 = vsel %vm809_vm11, %v808_v32, %v703_v29 }
 0x1cd   : > { %v812_v36 = vsel %vm811_vm12, %v810_v34, %v712_v31 }
 0x1ce   : > { %v814_v38 = vsel %vm813_vm13, %v812_v36, %v728_v33  ;;  %v766_v11 = vpop.permute.xlu1 %765 }
 0x1cf   : > { %v816_v43 = vsel %vm815_vm14, %v814_v38, %v737_v35  ;;  %v771_v49 = vrot.slane %v766_v11, %v770_v39 }
 0x1d0   : > { %v818_v44 = vsel %vm817_vm15, %v816_v43, %v746_v37 }
 0x1d1   : > { %v820_v52 = vsel %vm819_vm0, %v818_v44, %v755_v47 }
 0x1d2   : > { %v822_v58 = vsel %vm821_vm1, %v820_v52, %v771_v49 }
 0x1d3   : > { %v784_v53 = vpop.permute.xlu1 %783  ;;  %v824_v48 = vsel %vm823_vm2, %v822_v58, %v780_v60 }
 0x1d4   : > { %v789_v59 = vrot.slane %v784_v53, %v788_v51 }
 0x1d6   : > { %v826_v63 = vsel %vm825_vm3, %v824_v48, %v789_v59 }
 0x1d8   : > { %v793_v61 = vpop.permute.xlu1 %792 }
 0x1d9   : > { %v798_v50 = vrot.slane %v793_v61, %v797_v56 }
 0x1db   : > { %v828_v1 = vsel %vm827_vm4, %v826_v63, %v798_v50 }
 0x1dc   : > { %1239 = vmatmul.mubr.msk.f32.vlgmr.msra.gmra.mrb[0].mxu1 %vm837_vm8, %v828_v1 }
 0x1dd   : > { %1247 = vmatpush3.msk.msra.mxu1 %vm917_vm6, %v991_v0  ;;  %1248 = vmatprep.mubr.msk.f32.mxu1 %vm1409_vm5, %v1410_v42  ;;  %vm1071_vm5 = vcmask 516096  }
 0x2af   : > { %v907_v54 = vpop.f32.mrb[0].mxu1 }
 0x2b0   : > { %v911_v4 = vmax.f32 %v907_v54, 0.0  ;;  %v1240_v5 = vpop.f32.mrb[1].mxu1 }
 0x2b2   : > { %1244 = vmatmul.mubr.msk.f32.vlgmr.msra.gmra.mrb[8].mxu0 %vm800_vm7, %v911_v4  ;;  %1249 = vmatmul.mubr.msk.f32.vlgmr.msra.gmra.mrb[2].mxu1 %vm800_vm7, %v911_v4 }
 0x385   : > { %v987_v2 = vpop.f32.mrb[8].mxu0  ;;  %v1062_v9 = vpop.f32.mrb[2].mxu1 }
 0x386   : > { %v988_v42 = vadd.f32 %v987_v2, %v913_v6  ;;  %v1063_v10 = vadd.f32 %v1062_v9, %v992_v8  ;;  %v1245_v14 = vpop.f32.mrb[9].mxu0  ;;  %v1250_v15 = vpop.f32.mrb[3].mxu1 }
 0x388   : > { %v1066_v16 = vsub.f32 %v1063_v10, %v988_v42 }
 0x38a   : > { %v1067_v18 = vmul.f32 1.442695, %v1066_v16 }
 0x38c   : > { %1331 = vpow2.f32 %v1067_v18 }
 0x396   : > { %v1332_v57 = vpop.eup %1331 }
 0x397   : > { %v1069_v13 = vadd.f32 1.0, %v1332_v57 }
 0x399   : > { %1333 = vrcp.f32 %v1069_v13 }
 0x3a3   : > { %v1334_v19 = vpop.eup %1333 }
 0x3a4   : > { %1072 = vst.msk [vmem:[%s327_s26] sm:$0x1] %vm1071_vm5, %v1334_v19  ;;  %v1073_v20 = vsub.f32 1.0, %v1334_v19 }
 0x3a6   : > { %1074 = vst.msk [vmem:[%s330_s12] sm:$0x1] %vm1071_vm5, %v1073_v20 }
 0x3a7 PF: > { %p19_p8 = scmp.ge.s32.totalorder %s1478_s10, 4   ;;  %s1733_s27 = smov %s1391_s28 }
 0x3a8   : > { %s1734_s28 = smov %s1395_s29  ;;  %s1735_s29 = smov %s1488_s13 }
 0x3a9   : > { %s1736_s30 = smov %s1478_s10  ;;  %21 = sbr.rel (!%p19_p8) target bundleno = 3 (0x3), region = 100 }
 0x3b0   :  { %1104 = vsyncpa [#allocation3], 1 }
 0x3b1   :  { %1106 = vsyncpa [#allocation3 + $0x1], 1 }

</bundles_post_ra>
